<compile_context>
chip_gen: v7x
topology: tpu7x:2x2x1
jax: 0.10.0
libtpu: 0.0.40
codegen_flags: <defaults>
</compile_context>

<pallas_src>
import functools

import jax
import jax.numpy as jnp
from jax.experimental import pallas as pl
from jax.experimental.pallas import tpu as pltpu


_LANE = 128          # TPU lane width: pad every feature dim to a multiple of this
_BF16_SUBLANE = 16   # bf16 sublane packing: keep batch tiles a multiple of this


def _round_up(x, m):
    return ((x + m - 1) // m) * m


def _mlp_kernel(x_ref,
                w1_ref, b1_ref,
                w2_ref, b2_ref,
                w3_ref, b3_ref,
                w4_ref, b4_ref,
                w5_ref, b5_ref,
                w6_ref, b6_ref,
                o_ref):
    """Whole 6-layer MLP fused in one kernel (all weights resident in VMEM).

    Matmul operands are bf16 (fast MXU path), accumulation / bias / ReLU in f32.
    """
    h = x_ref[...]  # bf16 (block_b, F_pad)

    def linear(h_bf16, w_ref, b_ref, relu):
        y = jnp.dot(h_bf16, w_ref[...], preferred_element_type=jnp.float32)
        y = y + b_ref[...]          # bias is (1, out_pad) f32 -> broadcasts over batch
        if relu:
            y = jnp.maximum(y, 0.0)
        return y

    h = linear(h, w1_ref, b1_ref, True).astype(jnp.bfloat16)
    h = linear(h, w2_ref, b2_ref, True).astype(jnp.bfloat16)
    h = linear(h, w3_ref, b3_ref, True).astype(jnp.bfloat16)
    h = linear(h, w4_ref, b4_ref, True).astype(jnp.bfloat16)
    h = linear(h, w5_ref, b5_ref, True).astype(jnp.bfloat16)

    # Output layer: no ReLU.  Padded logit columns are exactly zero by construction.
    out = linear(h, w6_ref, b6_ref, False)
    o_ref[...] = out.astype(o_ref.dtype)


@functools.partial(jax.jit, static_argnames=("out_dim", "block_b"))
def dnn_forward(x, padded_params, *, out_dim=10, block_b=256):
    """x: (B, F) float32.  padded_params: list of (W_bf16 (in_pad,out_pad), b_f32 (1,out_pad))."""
    B, F = x.shape
    F_pad = padded_params[0][0].shape[0]
    out_pad = padded_params[-1][0].shape[1]

    # Batch tiling: large MXU-friendly tiles, but never bigger than the
    # (16-aligned) batch itself.  B is padded to an exact multiple of the tile
    # so every grid step is a full, unmasked block.
    block = min(_round_up(block_b, _BF16_SUBLANE), _round_up(B, _BF16_SUBLANE))
    B_pad = _round_up(B, block)

    # Zero-pad and cast x to bf16 (lane-dense, MXU-ready).
    x_p = jnp.pad(x, ((0, B_pad - B), (0, F_pad - F))).astype(jnp.bfloat16)

    # Flatten params into kernel argument order.
    flat = []
    for w, b in padded_params:
        flat.extend([w, b])

    grid = (B_pad // block,)

    # x is tiled over the batch; weights/biases use constant index maps so they
    # are fetched into VMEM once and stay resident (~1.7 MiB total in bf16).
    in_specs = [pl.BlockSpec((block, F_pad), lambda i: (i, 0))]
    for w, b in padded_params:
        in_specs.append(pl.BlockSpec(w.shape, lambda i: (0, 0)))
        in_specs.append(pl.BlockSpec(b.shape, lambda i: (0, 0)))

    out_specs = pl.BlockSpec((block, out_pad), lambda i: (i, 0))

    # Advisory cost estimate so XLA schedules/overlaps this call sensibly.
    flops = 2 * B_pad * sum(w.shape[0] * w.shape[1] for w, _ in padded_params)
    bytes_accessed = (
        x_p.size * 2
        + sum(w.size * 2 + b.size * 4 for w, b in padded_params)
        + B_pad * out_pad * 4
    )
    cost = pl.CostEstimate(flops=flops, transcendentals=0,
                           bytes_accessed=bytes_accessed)

    out = pl.pallas_call(
        _mlp_kernel,
        out_shape=jax.ShapeDtypeStruct((B_pad, out_pad), jnp.float32),
        grid_spec=pltpu.PrefetchScalarGridSpec(
            num_scalar_prefetch=0,
            grid=grid,
            in_specs=in_specs,
            out_specs=out_specs,
        ),
        compiler_params=pltpu.CompilerParams(
            dimension_semantics=("parallel",),   # batch axis shards across v7x's 2 TCs
        ),
        cost_estimate=cost,
    )(x_p, *flat)

    # Slice back to the logical shape.
    return out[:B, :out_dim]


def init_params(key, num_features):
    """Deterministic init matching the PyTorch module's layer shapes (f32, unpadded).

    nn.Linear(in, out) -> W: (out, in), b: (out,).  We mimic PyTorch's default
    uniform(-1/sqrt(in), 1/sqrt(in)) init, then store W transposed as (in, out)
    and b as (1, out).
    """
    dims = [num_features, 100, 100, 100, 100, 100, 10]
    params = []
    for i in range(6):
        fan_in, fan_out = dims[i], dims[i + 1]
        key, kw, kb = jax.random.split(key, 3)
        bound = 1.0 / jnp.sqrt(jnp.float32(fan_in))
        w_torch = jax.random.uniform(kw, (fan_out, fan_in), jnp.float32,
                                     minval=-bound, maxval=bound)
        b_torch = jax.random.uniform(kb, (fan_out,), jnp.float32,
                                     minval=-bound, maxval=bound)
        params.append((w_torch.T, b_torch.reshape(1, fan_out)))
    return params


def pad_params(params):
    """Zero-pad every layer to lane-aligned (multiple-of-128) dims; weights -> bf16."""
    padded = []
    for w, b in params:
        fin, fout = w.shape
        fin_p, fout_p = _round_up(fin, _LANE), _round_up(fout, _LANE)
        w_p = jnp.zeros((fin_p, fout_p), jnp.float32).at[:fin, :fout].set(w)
        b_p = jnp.zeros((1, fout_p), jnp.float32).at[:, :fout].set(b)
        padded.append((w_p.astype(jnp.bfloat16), b_p))
    return padded


def reference_forward(x, params):
    """Plain-JAX f32 reference for correctness checking."""
    h = x
    for i, (w, b) in enumerate(params):
        h = h @ w + b
        if i < len(params) - 1:
            h = jnp.maximum(h, 0.0)
    return h


if __name__ == "__main__":
    key = jax.random.PRNGKey(0)
    num_features = 784   # MNIST 28*28, as implied by the original script
    batch = 8

    key, kx = jax.random.split(key)
    x = jax.random.normal(kx, (batch, num_features), jnp.float32)

    raw_params = init_params(key, num_features)
    kernel_params = pad_params(raw_params)

    out = dnn_forward(x, kernel_params, out_dim=10)
    out = jax.block_until_ready(out)

    ref = reference_forward(x, raw_params)
    assert out.shape == (batch, 10)
    max_err = float(jnp.max(jnp.abs(out - ref)))
    # bf16 MXU operands with f32 accumulation: small relative error vs f32 reference.
    assert max_err < 5e-2, f"mismatch vs reference: max abs err {max_err}"

    print("KERNEL_OK")
</pallas_src>

<mosaic_0001>
module attributes {stable_mosaic.version = 11 : i64} {
  func.func @_mlp_kernel(%arg0: i32, %arg1: memref<16x896xbf16, #tpu.memory_space<vmem>>, %arg2: memref<896x128xbf16, #tpu.memory_space<vmem>>, %arg3: memref<1x128xf32, #tpu.memory_space<vmem>>, %arg4: memref<128x128xbf16, #tpu.memory_space<vmem>>, %arg5: memref<1x128xf32, #tpu.memory_space<vmem>>, %arg6: memref<128x128xbf16, #tpu.memory_space<vmem>>, %arg7: memref<1x128xf32, #tpu.memory_space<vmem>>, %arg8: memref<128x128xbf16, #tpu.memory_space<vmem>>, %arg9: memref<1x128xf32, #tpu.memory_space<vmem>>, %arg10: memref<128x128xbf16, #tpu.memory_space<vmem>>, %arg11: memref<1x128xf32, #tpu.memory_space<vmem>>, %arg12: memref<128x128xbf16, #tpu.memory_space<vmem>>, %arg13: memref<1x128xf32, #tpu.memory_space<vmem>>, %arg14: memref<16x128xf32, #tpu.memory_space<vmem>>) attributes {dimension_semantics = [#tpu.dimension_semantics<parallel>], iteration_bounds = array<i64: 1>, scalar_prefetch = 0 : i64, scratch_operands = 0 : i64, tpu.core_type = #tpu.core_type<tc>, window_params = [{transform_indices = @transform_0, window_bounds = array<i64: 16, 896>}, {pipeline_mode = #tpu.pipeline_mode<synchronous>, transform_indices = @transform_1, window_bounds = array<i64: 896, 128>}, {pipeline_mode = #tpu.pipeline_mode<synchronous>, transform_indices = @transform_2, window_bounds = array<i64: 1, 128>}, {pipeline_mode = #tpu.pipeline_mode<synchronous>, transform_indices = @transform_3, window_bounds = array<i64: 128, 128>}, {pipeline_mode = #tpu.pipeline_mode<synchronous>, transform_indices = @transform_4, window_bounds = array<i64: 1, 128>}, {pipeline_mode = #tpu.pipeline_mode<synchronous>, transform_indices = @transform_5, window_bounds = array<i64: 128, 128>}, {pipeline_mode = #tpu.pipeline_mode<synchronous>, transform_indices = @transform_6, window_bounds = array<i64: 1, 128>}, {pipeline_mode = #tpu.pipeline_mode<synchronous>, transform_indices = @transform_7, window_bounds = array<i64: 128, 128>}, {pipeline_mode = #tpu.pipeline_mode<synchronous>, transform_indices = @transform_8, window_bounds = array<i64: 1, 128>}, {pipeline_mode = #tpu.pipeline_mode<synchronous>, transform_indices = @transform_9, window_bounds = array<i64: 128, 128>}, {pipeline_mode = #tpu.pipeline_mode<synchronous>, transform_indices = @transform_10, window_bounds = array<i64: 1, 128>}, {pipeline_mode = #tpu.pipeline_mode<synchronous>, transform_indices = @transform_11, window_bounds = array<i64: 128, 128>}, {pipeline_mode = #tpu.pipeline_mode<synchronous>, transform_indices = @transform_12, window_bounds = array<i64: 1, 128>}, {transform_indices = @transform_13, window_bounds = array<i64: 16, 128>}]} {
    %c0 = arith.constant 0 : index
    %c0_0 = arith.constant 0 : index
    %0 = vector.load %arg1[%c0, %c0_0] : memref<16x896xbf16, #tpu.memory_space<vmem>>, vector<16x896xbf16>
    %c0_1 = arith.constant 0 : index
    %c0_2 = arith.constant 0 : index
    %1 = vector.load %arg2[%c0_1, %c0_2] : memref<896x128xbf16, #tpu.memory_space<vmem>>, vector<896x128xbf16>
    %cst = arith.constant dense<0.000000e+00> : vector<16x128xf32>
    %2 = tpu.matmul %0, %1, %cst {dimension_numbers = #tpu.dot_dimension_numbers<[1], [0], [0], [1], [0, 0, 1, 1], [], []>} : vector<16x896xbf16>, vector<896x128xbf16>, vector<16x128xf32> -> vector<16x128xf32>
    %c0_3 = arith.constant 0 : index
    %c0_4 = arith.constant 0 : index
    %3 = vector.load %arg3[%c0_3, %c0_4] : memref<1x128xf32, #tpu.memory_space<vmem>>, vector<1x128xf32>
    %4 = vector.broadcast %3 : vector<1x128xf32> to vector<16x128xf32>
    %5 = arith.addf %2, %4 : vector<16x128xf32>
    %cst_5 = arith.constant 0.000000e+00 : f32
    %6 = vector.broadcast %cst_5 : f32 to vector<16x128xf32>
    %7 = arith.maximumf %5, %6 : vector<16x128xf32>
    %8 = arith.truncf %7 : vector<16x128xf32> to vector<16x128xbf16>
    %c0_6 = arith.constant 0 : index
    %c0_7 = arith.constant 0 : index
    %9 = vector.load %arg4[%c0_6, %c0_7] : memref<128x128xbf16, #tpu.memory_space<vmem>>, vector<128x128xbf16>
    %cst_8 = arith.constant dense<0.000000e+00> : vector<16x128xf32>
    %10 = tpu.matmul %8, %9, %cst_8 {dimension_numbers = #tpu.dot_dimension_numbers<[1], [0], [0], [1], [0, 0, 1, 1], [], []>} : vector<16x128xbf16>, vector<128x128xbf16>, vector<16x128xf32> -> vector<16x128xf32>
    %c0_9 = arith.constant 0 : index
    %c0_10 = arith.constant 0 : index
    %11 = vector.load %arg5[%c0_9, %c0_10] : memref<1x128xf32, #tpu.memory_space<vmem>>, vector<1x128xf32>
    %12 = vector.broadcast %11 : vector<1x128xf32> to vector<16x128xf32>
    %13 = arith.addf %10, %12 : vector<16x128xf32>
    %cst_11 = arith.constant 0.000000e+00 : f32
    %14 = vector.broadcast %cst_11 : f32 to vector<16x128xf32>
    %15 = arith.maximumf %13, %14 : vector<16x128xf32>
    %16 = arith.truncf %15 : vector<16x128xf32> to vector<16x128xbf16>
    %c0_12 = arith.constant 0 : index
    %c0_13 = arith.constant 0 : index
    %17 = vector.load %arg6[%c0_12, %c0_13] : memref<128x128xbf16, #tpu.memory_space<vmem>>, vector<128x128xbf16>
    %cst_14 = arith.constant dense<0.000000e+00> : vector<16x128xf32>
    %18 = tpu.matmul %16, %17, %cst_14 {dimension_numbers = #tpu.dot_dimension_numbers<[1], [0], [0], [1], [0, 0, 1, 1], [], []>} : vector<16x128xbf16>, vector<128x128xbf16>, vector<16x128xf32> -> vector<16x128xf32>
    %c0_15 = arith.constant 0 : index
    %c0_16 = arith.constant 0 : index
    %19 = vector.load %arg7[%c0_15, %c0_16] : memref<1x128xf32, #tpu.memory_space<vmem>>, vector<1x128xf32>
    %20 = vector.broadcast %19 : vector<1x128xf32> to vector<16x128xf32>
    %21 = arith.addf %18, %20 : vector<16x128xf32>
    %cst_17 = arith.constant 0.000000e+00 : f32
    %22 = vector.broadcast %cst_17 : f32 to vector<16x128xf32>
    %23 = arith.maximumf %21, %22 : vector<16x128xf32>
    %24 = arith.truncf %23 : vector<16x128xf32> to vector<16x128xbf16>
    %c0_18 = arith.constant 0 : index
    %c0_19 = arith.constant 0 : index
    %25 = vector.load %arg8[%c0_18, %c0_19] : memref<128x128xbf16, #tpu.memory_space<vmem>>, vector<128x128xbf16>
    %cst_20 = arith.constant dense<0.000000e+00> : vector<16x128xf32>
    %26 = tpu.matmul %24, %25, %cst_20 {dimension_numbers = #tpu.dot_dimension_numbers<[1], [0], [0], [1], [0, 0, 1, 1], [], []>} : vector<16x128xbf16>, vector<128x128xbf16>, vector<16x128xf32> -> vector<16x128xf32>
    %c0_21 = arith.constant 0 : index
    %c0_22 = arith.constant 0 : index
    %27 = vector.load %arg9[%c0_21, %c0_22] : memref<1x128xf32, #tpu.memory_space<vmem>>, vector<1x128xf32>
    %28 = vector.broadcast %27 : vector<1x128xf32> to vector<16x128xf32>
    %29 = arith.addf %26, %28 : vector<16x128xf32>
    %cst_23 = arith.constant 0.000000e+00 : f32
    %30 = vector.broadcast %cst_23 : f32 to vector<16x128xf32>
    %31 = arith.maximumf %29, %30 : vector<16x128xf32>
    %32 = arith.truncf %31 : vector<16x128xf32> to vector<16x128xbf16>
    %c0_24 = arith.constant 0 : index
    %c0_25 = arith.constant 0 : index
    %33 = vector.load %arg10[%c0_24, %c0_25] : memref<128x128xbf16, #tpu.memory_space<vmem>>, vector<128x128xbf16>
    %cst_26 = arith.constant dense<0.000000e+00> : vector<16x128xf32>
    %34 = tpu.matmul %32, %33, %cst_26 {dimension_numbers = #tpu.dot_dimension_numbers<[1], [0], [0], [1], [0, 0, 1, 1], [], []>} : vector<16x128xbf16>, vector<128x128xbf16>, vector<16x128xf32> -> vector<16x128xf32>
    %c0_27 = arith.constant 0 : index
    %c0_28 = arith.constant 0 : index
    %35 = vector.load %arg11[%c0_27, %c0_28] : memref<1x128xf32, #tpu.memory_space<vmem>>, vector<1x128xf32>
    %36 = vector.broadcast %35 : vector<1x128xf32> to vector<16x128xf32>
    %37 = arith.addf %34, %36 : vector<16x128xf32>
    %cst_29 = arith.constant 0.000000e+00 : f32
    %38 = vector.broadcast %cst_29 : f32 to vector<16x128xf32>
    %39 = arith.maximumf %37, %38 : vector<16x128xf32>
    %40 = arith.truncf %39 : vector<16x128xf32> to vector<16x128xbf16>
    %c0_30 = arith.constant 0 : index
    %c0_31 = arith.constant 0 : index
    %41 = vector.load %arg12[%c0_30, %c0_31] : memref<128x128xbf16, #tpu.memory_space<vmem>>, vector<128x128xbf16>
    %cst_32 = arith.constant dense<0.000000e+00> : vector<16x128xf32>
    %42 = tpu.matmul %40, %41, %cst_32 {dimension_numbers = #tpu.dot_dimension_numbers<[1], [0], [0], [1], [0, 0, 1, 1], [], []>} : vector<16x128xbf16>, vector<128x128xbf16>, vector<16x128xf32> -> vector<16x128xf32>
    %c0_33 = arith.constant 0 : index
    %c0_34 = arith.constant 0 : index
    %43 = vector.load %arg13[%c0_33, %c0_34] : memref<1x128xf32, #tpu.memory_space<vmem>>, vector<1x128xf32>
    %44 = vector.broadcast %43 : vector<1x128xf32> to vector<16x128xf32>
    %45 = arith.addf %42, %44 : vector<16x128xf32>
    %c0_35 = arith.constant 0 : index
    %c0_36 = arith.constant 0 : index
    %46 = vector.load %arg14[%c0_35, %c0_36] : memref<16x128xf32, #tpu.memory_space<vmem>>, vector<16x128xf32>
    tpu.vector_store %arg14[%c0_35, %c0_36], %45 {strides = array<i32>} : memref<16x128xf32, #tpu.memory_space<vmem>>, vector<16x128xf32>,
    return
  }
  func.func @transform_0(%arg0: i32) -> (i32, i32) {
    %c0_i32 = arith.constant 0 : i32
    %c0_i32_0 = arith.constant 0 : i32
    return %arg0, %c0_i32 : i32, i32
  }
  func.func @transform_1(%arg0: i32) -> (i32, i32) {
    %c0_i32 = arith.constant 0 : i32
    %c0_i32_0 = arith.constant 0 : i32
    %c0_i32_1 = arith.constant 0 : i32
    return %c0_i32, %c0_i32_0 : i32, i32
  }
  func.func @transform_2(%arg0: i32) -> (i32, i32) {
    %c0_i32 = arith.constant 0 : i32
    %c0_i32_0 = arith.constant 0 : i32
    %c0_i32_1 = arith.constant 0 : i32
    return %c0_i32, %c0_i32_0 : i32, i32
  }
  func.func @transform_3(%arg0: i32) -> (i32, i32) {
    %c0_i32 = arith.constant 0 : i32
    %c0_i32_0 = arith.constant 0 : i32
    %c0_i32_1 = arith.constant 0 : i32
    return %c0_i32, %c0_i32_0 : i32, i32
  }
  func.func @transform_4(%arg0: i32) -> (i32, i32) {
    %c0_i32 = arith.constant 0 : i32
    %c0_i32_0 = arith.constant 0 : i32
    %c0_i32_1 = arith.constant 0 : i32
    return %c0_i32, %c0_i32_0 : i32, i32
  }
  func.func @transform_5(%arg0: i32) -> (i32, i32) {
    %c0_i32 = arith.constant 0 : i32
    %c0_i32_0 = arith.constant 0 : i32
    %c0_i32_1 = arith.constant 0 : i32
    return %c0_i32, %c0_i32_0 : i32, i32
  }
  func.func @transform_6(%arg0: i32) -> (i32, i32) {
    %c0_i32 = arith.constant 0 : i32
    %c0_i32_0 = arith.constant 0 : i32
    %c0_i32_1 = arith.constant 0 : i32
    return %c0_i32, %c0_i32_0 : i32, i32
  }
  func.func @transform_7(%arg0: i32) -> (i32, i32) {
    %c0_i32 = arith.constant 0 : i32
    %c0_i32_0 = arith.constant 0 : i32
    %c0_i32_1 = arith.constant 0 : i32
    return %c0_i32, %c0_i32_0 : i32, i32
  }
  func.func @transform_8(%arg0: i32) -> (i32, i32) {
    %c0_i32 = arith.constant 0 : i32
    %c0_i32_0 = arith.constant 0 : i32
    %c0_i32_1 = arith.constant 0 : i32
    return %c0_i32, %c0_i32_0 : i32, i32
  }
  func.func @transform_9(%arg0: i32) -> (i32, i32) {
    %c0_i32 = arith.constant 0 : i32
    %c0_i32_0 = arith.constant 0 : i32
    %c0_i32_1 = arith.constant 0 : i32
    return %c0_i32, %c0_i32_0 : i32, i32
  }
  func.func @transform_10(%arg0: i32) -> (i32, i32) {
    %c0_i32 = arith.constant 0 : i32
    %c0_i32_0 = arith.constant 0 : i32
    %c0_i32_1 = arith.constant 0 : i32
    return %c0_i32, %c0_i32_0 : i32, i32
  }
  func.func @transform_11(%arg0: i32) -> (i32, i32) {
    %c0_i32 = arith.constant 0 : i32
    %c0_i32_0 = arith.constant 0 : i32
    %c0_i32_1 = arith.constant 0 : i32
    return %c0_i32, %c0_i32_0 : i32, i32
  }
  func.func @transform_12(%arg0: i32) -> (i32, i32) {
    %c0_i32 = arith.constant 0 : i32
    %c0_i32_0 = arith.constant 0 : i32
    %c0_i32_1 = arith.constant 0 : i32
    return %c0_i32, %c0_i32_0 : i32, i32
  }
  func.func @transform_13(%arg0: i32) -> (i32, i32) {
    %c0_i32 = arith.constant 0 : i32
    %c0_i32_0 = arith.constant 0 : i32
    return %arg0, %c0_i32 : i32, i32
  }
}

</mosaic_0001>

<bundles_post_ra>
// kernel: dnn_forward.1
= control target key start
LH: loop header
LB: loop body
LE: loop exit
PB: predicated region body
PF: predicated region fallthrough
CT: control target
= control target key end

     0   :  { %18 = vsyncpa [#allocation3], 0  ;;  %s2170_s0 = inlined_call_operand.vmem [shape: bf16[16,896], index: 0, kind: input, shape index: {}]   ;;  %s2171_s1 = inlined_call_operand.hbm [shape: bf16[896,128], index: 1, kind: input, shape index: {}]   ;;  %s2172_s2 = inlined_call_operand.vmem [shape: f32[1,128], index: 2, kind: input, shape index: {}]   ;;  %s2173_s3 = inlined_call_operand.vmem [shape: bf16[128,128], index: 3, kind: input, shape index: {}]   ;;  %s2174_s4 = inlined_call_operand.vmem [shape: f32[1,128], index: 4, kind: input, shape index: {}]   ;;  %s2175_s5 = inlined_call_operand.vmem [shape: bf16[128,128], index: 5, kind: input, shape index: {}]   ;;  %s2176_s6 = inlined_call_operand.vmem [shape: f32[1,128], index: 6, kind: input, shape index: {}]   ;;  %s2177_s7 = inlined_call_operand.vmem [shape: bf16[128,128], index: 7, kind: input, shape index: {}]   ;;  %s2178_s8 = inlined_call_operand.vmem [shape: f32[1,128], index: 8, kind: input, shape index: {}]   ;;  %s2179_s9 = inlined_call_operand.hbm [shape: bf16[128,128], index: 9, kind: input, shape index: {}]   ;;  %s2180_s10 = inlined_call_operand.vmem [shape: f32[1,128], index: 10, kind: input, shape index: {}]   ;;  %s2181_s11 = inlined_call_operand.hbm [shape: bf16[128,128], index: 11, kind: input, shape index: {}]   ;;  %s2182_s12 = inlined_call_operand.vmem [shape: f32[1,128], index: 12, kind: input, shape index: {}]   ;;  %s2183_s13 = inlined_call_operand.vmem [shape: f32[16,128], index: 13, kind: output, shape index: {}]  }
   0x1   :  { %19 = vsyncpa [#allocation5], 0  ;;  %s1864_s25 = smov [#allocation4]   ;;  %s1865_s27 = smov [#allocation2]  }
   0x2   :  { %s53_s26 = sshll.u32 %s1864_s25, 4  ;;  %s27_s28 = sshll.u32 %s1865_s27, 4  ;;  %s54_s26 = int_to_ptr.vmem [resolvable:$true] %s53_s26  ;;  %s1941_s28 = int_to_ptr.vmem [resolvable:$true] %s27_s28 }
   0x3   :  { %s1794_s14 = scalar_lea.hbm %s2179_s9, 1024 }
   0x4   :  { %p1795_p0 = scmp.ne.s32.totalorder %s2179_s9, %s1794_s14  ;;  %p1798_p1 = scmp.lt.u32.totalorder %s1794_s14, %s2179_s9 }
   0x6   :  { %p1800_p2 = pnand %p1798_p1, %p1795_p0 }
   0x8   :  { %1803 = shalt.err (!%p1800_p2)
}
   0x9   :  { %s1804_s19 = scalar_lea.vmem %s54_s26, 1024  ;;  %p1809_p4 = scmp.lt.s32.totalorder %s54_s26, %s54_s26 }
   0xa   :  { %p1805_p3 = scmp.ne.s32.totalorder %s54_s26, %s1804_s19  ;;  %p1810_p5 = scmp.lt.s32.totalorder %s1804_s19, %s1804_s19 }
   0xc   :  { %p1811_p6 = por %p1810_p5, %p1809_p4 }
   0xe   :  { %p1812_p7 = pnand %p1811_p6, %p1805_p3 }
  0x10   :  { %1815 = shalt.err (!%p1812_p7)
}
  0x11   :  { %s1866_s20 = smov 64   ;;  %s1867_s21 = smov 4  }
  0x12   :  { %59 = dma.hbm_to_vmem [thread:$0]  %s2179_s9, 1024, %s54_s26, [#allocation5], %s1866_s20, %s1866_s20, %s1867_s21  }
  0x13   :  { %s1816_s27 = scalar_lea.hbm %s2171_s1, 7168 }
  0x14   :  { %p1817_p8 = scmp.ne.s32.totalorder %s2171_s1, %s1816_s27  ;;  %p1820_p9 = scmp.lt.u32.totalorder %s1816_s27, %s2171_s1 }
  0x16   :  { %p1822_p10 = pnand %p1820_p9, %p1817_p8 }
  0x18   :  { %1825 = shalt.err (!%p1822_p10)
}
  0x19   :  { %s1826_s16 = scalar_lea.vmem %s1941_s28, 7168  ;;  %p1831_p12 = scmp.lt.s32.totalorder %s1941_s28, %s1941_s28 }
  0x1a   :  { %p1827_p11 = scmp.ne.s32.totalorder %s1941_s28, %s1826_s16  ;;  %p1832_p13 = scmp.lt.s32.totalorder %s1826_s16, %s1826_s16 }
  0x1c   :  { %p1833_p0 = por %p1832_p13, %p1831_p12 }
  0x1e   :  { %p1834_p1 = pnand %p1833_p0, %p1827_p11 }
  0x20   :  { %1837 = shalt.err (!%p1834_p1)
}
  0x21   :  { %33 = dma.hbm_to_vmem [thread:$0]  %s2171_s1, 7168, %s1941_s28, [#allocation3], %s1866_s20, %s1866_s20, %s1867_s21  }
  0x22   :  { %s1868_s17 = smov [#allocation6]   ;;  %s1838_s23 = scalar_lea.hbm %s2181_s11, 1024 }
  0x23   :  { %s67_s18 = sshll.u32 %s1868_s17, 4  ;;  %p1839_p2 = scmp.ne.s32.totalorder %s2181_s11, %s1838_s23  ;;  %s68_s18 = int_to_ptr.vmem [resolvable:$true] %s67_s18 }
  0x24   :  { %p1842_p3 = scmp.lt.u32.totalorder %s1838_s23, %s2181_s11 }
  0x26   :  { %p1844_p4 = pnand %p1842_p3, %p1839_p2 }
  0x28   :  { %1847 = shalt.err (!%p1844_p4)
}
  0x29   :  { %s1848_s30 = scalar_lea.vmem %s68_s18, 1024  ;;  %p1853_p6 = scmp.lt.s32.totalorder %s68_s18, %s68_s18 }
  0x2a   :  { %p1849_p5 = scmp.ne.s32.totalorder %s68_s18, %s1848_s30  ;;  %p1854_p7 = scmp.lt.s32.totalorder %s1848_s30, %s1848_s30 }
  0x2c   :  { %p1855_p8 = por %p1854_p7, %p1853_p6 }
  0x2e   :  { %p1856_p9 = pnand %p1855_p8, %p1849_p5 }
  0x30   :  { %1859 = shalt.err (!%p1856_p9)
}
  0x31   :  { %73 = dma.hbm_to_vmem [thread:$0]  %s2181_s11, 1024, %s68_s18, [#allocation5], %s1866_s20, %s1866_s20, %s1867_s21  }
  0x32   :  { %1860 = dma.done.wait [#allocation3], 7168  }
  0x33   :  { %1861 = vsyncadd [#allocation3], 4294960128 }
  0x34   :  { %1862 = dma.done.wait [#allocation5], 2048  }
  0x35   :  { %1863 = vsyncadd [#allocation5], 4294965248  ;;  %v1688_v0 = vld [vmem:[#allocation2 + $0x40] sm:$0xff]   ;;  %v1692_v4 = vld [vmem:[#allocation2 + $0x48] sm:$0xff]   ;;  %v1869_v38 = vmov 0.0   ;;  %vm1870_vm0 = vmmov 0  }
  0x36   :  { %v1689_v1 = vld [vmem:[#allocation2] sm:$0xff]   ;;  %1441 = vmatprep.subr.bf16.mxu0 %v1688_v0  ;;  %v1693_v5 = vld [vmem:[#allocation2 + $0x8] sm:$0xff]   ;;  %v1696_v8 = vld [vmem:[#allocation2 + $0x50] sm:$0xff]  }
  0x37   :  { %v1690_v2 = vld [vmem:[#allocation2 + $0xc0] sm:$0xff]   ;;  %1442 = vmatpush3.bf16.msra.mxu0 %v1689_v1  ;;  %v1694_v6 = vld [vmem:[#allocation2 + $0xc8] sm:$0xff]   ;;  %v1697_v9 = vld [vmem:[#allocation2 + $0x10] sm:$0xff]  }
  0x38   :  { %v1691_v3 = vld [vmem:[#allocation2 + $0x80] sm:$0xff]   ;;  %1463 = vmatprep.subr.bf16.mxu1 %v1690_v2  ;;  %1443 = vmatprep.subr.bf16.mxu0 %v1692_v4  ;;  %v1695_v7 = vld [vmem:[#allocation2 + $0x88] sm:$0xff]   ;;  %v1698_v10 = vld [vmem:[#allocation2 + $0xd0] sm:$0xff]  }
  0x39   :  { %1464 = vmatpush3.bf16.msra.mxu1 %v1691_v3  ;;  %v1699_v11 = vld [vmem:[#allocation2 + $0x90] sm:$0xff]   ;;  %v1700_v12 = vld [vmem:[#allocation2 + $0x58] sm:$0xff]   ;;  %v1704_v16 = vld [vmem:[#allocation2 + $0x60] sm:$0xff]  }
  0x3a   :  { %1465 = vmatprep.subr.bf16.mxu1 %v1694_v6  ;;  %v1701_v13 = vld [vmem:[#allocation2 + $0x18] sm:$0xff]   ;;  %v1705_v17 = vld [vmem:[#allocation2 + $0x20] sm:$0xff]   ;;  %v1708_v20 = vld [vmem:[#allocation2 + $0x68] sm:$0xff]  }
  0x3b   :  { %1444 = vmatpush3.bf16.msra.mxu0 %v1693_v5  ;;  %v1702_v14 = vld [vmem:[#allocation2 + $0xd8] sm:$0xff]   ;;  %v1706_v18 = vld [vmem:[#allocation2 + $0xe0] sm:$0xff]   ;;  %v1709_v21 = vld [vmem:[#allocation2 + $0x28] sm:$0xff]  }
  0x3c   :  { %1445 = vmatprep.subr.bf16.mxu0 %v1696_v8  ;;  %v1703_v15 = vld [vmem:[#allocation2 + $0x98] sm:$0xff]   ;;  %v1707_v19 = vld [vmem:[#allocation2 + $0xa0] sm:$0xff]   ;;  %v1710_v22 = vld [vmem:[#allocation2 + $0xe8] sm:$0xff]  }
  0x3d   :  { %1466 = vmatpush3.bf16.msra.mxu1 %v1695_v7  ;;  %v1711_v23 = vld [vmem:[#allocation2 + $0xa8] sm:$0xff]   ;;  %v1712_v24 = vld [vmem:[#allocation2 + $0x70] sm:$0xff]   ;;  %v1716_v28 = vld [vmem:[#allocation2 + $0x78] sm:$0xff]  }
  0x3e   :  { %1467 = vmatprep.subr.bf16.mxu1 %v1698_v10  ;;  %v1713_v25 = vld [vmem:[#allocation2 + $0x30] sm:$0xff]   ;;  %v1717_v29 = vld [vmem:[#allocation2 + $0x38] sm:$0xff]   ;;  %v1721_v32 = vld [vmem:[%s2170_s0 + $0x4] ss:$28 sps:$4 sm:$0xff]  }
  0x3f   :  { %1446 = vmatpush3.bf16.msra.mxu0 %v1697_v9  ;;  %v1714_v26 = vld [vmem:[#allocation2 + $0xf0] sm:$0xff]   ;;  %v1718_v30 = vld [vmem:[#allocation2 + $0xf8] sm:$0xff]   ;;  %617 = vmatprep.mubr.bf16.mxu0 %v1721_v32  ;;  %v1723_v34 = vld [vmem:[#allocation2 + $0x140] sm:$0xff]  }
  0x40   :  { %1447 = vmatprep.subr.bf16.mxu0 %v1700_v12  ;;  %v1715_v27 = vld [vmem:[#allocation2 + $0xb0] sm:$0xff]   ;;  %v1719_v31 = vld [vmem:[%s2170_s0] ss:$28 sps:$4 sm:$0xff]   ;;  %v1724_v35 = vld [vmem:[%s2170_s0 + $0x8] ss:$28 sps:$4 sm:$0xff]  }
  0x41   :  { %1468 = vmatpush3.bf16.msra.mxu1 %v1699_v11  ;;  %v1722_v33 = vld [vmem:[#allocation2 + $0xb8] sm:$0xff]   ;;  %v1726_v36 = vld [vmem:[%s2170_s0 + $0xc] ss:$28 sps:$4 sm:$0xff]   ;;  %v1727_v37 = vld [vmem:[#allocation2 + $0x100] sm:$0xff]  }
  0x42   :  { %1469 = vmatprep.subr.bf16.mxu1 %v1702_v14  ;;  %658 = vmatprep.mubr.bf16.mxu1 %v1726_v36  ;;  %v1728_v39 = vld [vmem:[#allocation2 + $0x180] sm:$0xff]   ;;  %v1729_v40 = vld [vmem:[#allocation2 + $0x148] sm:$0xff]   ;;  %v1732_v43 = vld [vmem:[#allocation2 + $0x150] sm:$0xff]  }
  0x43   :  { %1448 = vmatpush3.bf16.msra.mxu0 %v1701_v13  ;;  %v1730_v41 = vld [vmem:[#allocation2 + $0x108] sm:$0xff]   ;;  %v1733_v44 = vld [vmem:[#allocation2 + $0x110] sm:$0xff]   ;;  %v1735_v46 = vld [vmem:[#allocation2 + $0x158] sm:$0xff]  }
  0x44   :  { %1449 = vmatprep.subr.bf16.mxu0 %v1704_v16  ;;  %v1731_v42 = vld [vmem:[#allocation2 + $0x188] sm:$0xff]   ;;  %v1734_v45 = vld [vmem:[#allocation2 + $0x190] sm:$0xff]   ;;  %v1736_v47 = vld [vmem:[#allocation2 + $0x118] sm:$0xff]  }
  0x45   :  { %1470 = vmatpush3.bf16.msra.mxu1 %v1703_v15  ;;  %v1737_v48 = vld [vmem:[#allocation2 + $0x198] sm:$0xff]   ;;  %v1738_v49 = vld [vmem:[#allocation2 + $0x160] sm:$0xff]   ;;  %v1741_v52 = vld [vmem:[#allocation2 + $0x168] sm:$0xff]  }
  0x46   :  { %1471 = vmatprep.subr.bf16.mxu1 %v1706_v18  ;;  %v1739_v50 = vld [vmem:[#allocation2 + $0x120] sm:$0xff]   ;;  %v1742_v53 = vld [vmem:[#allocation2 + $0x128] sm:$0xff]   ;;  %v1744_v55 = vld [vmem:[#allocation2 + $0x170] sm:$0xff]  }
  0x47   :  { %1450 = vmatpush3.bf16.msra.mxu0 %v1705_v17  ;;  %v1740_v51 = vld [vmem:[#allocation2 + $0x1a0] sm:$0xff]   ;;  %v1743_v54 = vld [vmem:[#allocation2 + $0x1a8] sm:$0xff]   ;;  %v1745_v56 = vld [vmem:[#allocation2 + $0x130] sm:$0xff]  }
  0x48   :  { %1451 = vmatprep.subr.bf16.mxu0 %v1708_v20  ;;  %v1746_v57 = vld [vmem:[#allocation2 + $0x1b0] sm:$0xff]   ;;  %v1747_v59 = vld [vmem:[#allocation2 + $0x178] sm:$0xff]   ;;  %v1754_v0 = vld [vmem:[%s2173_s3] sm:$0xff]  }
  0x49   :  { %1472 = vmatpush3.bf16.msra.mxu1 %v1707_v19  ;;  %v1751_v58 = vld [vmem:[%s2170_s0 + $0x14] ss:$28 sps:$4 sm:$0xff]   ;;  %v1748_v60 = vld [vmem:[#allocation2 + $0x138] sm:$0xff]   ;;  %v1755_v1 = vld [vmem:[%s2173_s3 + $0x8] sm:$0xff]  }
  0x4a   :  { %1473 = vmatprep.subr.bf16.mxu1 %v1710_v22  ;;  %v1752_v61 = vld [vmem:[#allocation2 + $0x1b8] sm:$0xff]   ;;  %v1749_v62 = vld [vmem:[%s2170_s0 + $0x10] ss:$28 sps:$4 sm:$0xff]   ;;  %v1758_v4 = vld [vmem:[%s2173_s3 + $0x20] sm:$0xff]  }
  0x4b   :  { %1452 = vmatpush3.bf16.msra.mxu0 %v1709_v21  ;;  %v1753_v63 = vld [vmem:[%s2170_s0 + $0x18] ss:$28 sps:$4 sm:$0xff]   ;;  %v1759_v5 = vld [vmem:[%s2173_s3 + $0x28] sm:$0xff]   ;;  %v1762_v8 = vld [vmem:[%s2175_s5] sm:$0xff]  }
  0x4c   :  { %1453 = vmatprep.subr.bf16.mxu0 %v1712_v24  ;;  %v1756_v2 = vld [vmem:[%s2173_s3 + $0x10] sm:$0xff]   ;;  %v1757_v3 = vld [vmem:[%s2173_s3 + $0x18] sm:$0xff]   ;;  %v1763_v9 = vld [vmem:[%s2175_s5 + $0x8] sm:$0xff]  }
  0x4d   :  { %1474 = vmatpush3.bf16.msra.mxu1 %v1711_v23  ;;  %v1760_v6 = vld [vmem:[%s2173_s3 + $0x30] sm:$0xff]   ;;  %v1761_v7 = vld [vmem:[%s2173_s3 + $0x38] sm:$0xff]   ;;  %v1766_v12 = vld [vmem:[%s2175_s5 + $0x20] sm:$0xff]  }
  0x4e   :  { %1475 = vmatprep.subr.bf16.mxu1 %v1714_v26  ;;  %v1764_v10 = vld [vmem:[%s2175_s5 + $0x10] sm:$0xff]   ;;  %v1765_v11 = vld [vmem:[%s2175_s5 + $0x18] sm:$0xff]   ;;  %v1767_v13 = vld [vmem:[%s2175_s5 + $0x28] sm:$0xff]  }
  0x4f   :  { %1454 = vmatpush3.bf16.msra.mxu0 %v1713_v25  ;;  %v1332_v15 = vld [vmem:[%s2172_s2] ss:$0 sm:$0xff] }
  0x50   :  { %1455 = vmatprep.subr.bf16.mxu0 %v1716_v28 }
  0x51   :  { %1476 = vmatpush3.bf16.msra.mxu1 %v1715_v27 }
  0x52   :  { %1477 = vmatprep.subr.bf16.mxu1 %v1718_v30 }
  0x53   :  { %1456 = vmatpush3.bf16.msra.mxu0 %v1717_v29 }
  0x54   :  { %1485 = vmatprep.subr.bf16.mxu0 %v1723_v34 }
  0x55   :  { %1478 = vmatpush3.bf16.msra.mxu1 %v1722_v33 }
  0x56   :  { %618 = vmatmul.mubr.bf16.vlgmr.msra.gmra.mrb[0].mxu0 %v1719_v31  ;;  %1561 = vmatprep.subr.bf16.mxu1 %v1869_v38 }
  0x57   :  { %1486 = vmatpush3.bf16.msra.mxu0 %v1727_v37  ;;  %699 = vmatprep.mubr.bf16.mxu0 %v1751_v58 }
  0x58   :  { %659 = vmatmul.mubr.bf16.vlgmr.msra.gmra.mrb[0].mxu1 %v1724_v35  ;;  %1487 = vmatprep.subr.bf16.mxu0 %v1729_v40 }
  0x59   :  { %1562 = vmatpush3.bf16.msra.mxu1 %v1728_v39  ;;  %1577 = vmatprep.mubr.msk.bf16.mxu1 %vm1870_vm0, %v1869_v38 }
  0x5a   :  { %1563 = vmatprep.subr.bf16.mxu1 %v1869_v38 }
  0x5b   :  { %1488 = vmatpush3.bf16.msra.mxu0 %v1730_v41 }
  0x5c   :  { %1489 = vmatprep.subr.bf16.mxu0 %v1732_v43 }
  0x5d   :  { %1564 = vmatpush3.bf16.msra.mxu1 %v1731_v42 }
  0x5e   :  { %1565 = vmatprep.subr.bf16.mxu1 %v1869_v38 }
  0x5f   :  { %1490 = vmatpush3.bf16.msra.mxu0 %v1733_v44 }
  0x60   :  { %1491 = vmatprep.subr.bf16.mxu0 %v1735_v46 }
  0x61   :  { %1566 = vmatpush3.bf16.msra.mxu1 %v1734_v45 }
  0x62   :  { %1567 = vmatprep.subr.bf16.mxu1 %v1869_v38 }
  0x63   :  { %1492 = vmatpush3.bf16.msra.mxu0 %v1736_v47 }
  0x64   :  { %1493 = vmatprep.subr.bf16.mxu0 %v1738_v49  ;;  %v1768_v49 = vld [vmem:[%s2175_s5 + $0x30] sm:$0xff]  }
  0x65   :  { %1568 = vmatpush3.bf16.msra.mxu1 %v1737_v48 }
  0x66   :  { %1569 = vmatprep.subr.bf16.mxu1 %v1869_v38 }
  0x67   :  { %1494 = vmatpush3.bf16.msra.mxu0 %v1739_v50  ;;  %v1769_v50 = vld [vmem:[%s2175_s5 + $0x38] sm:$0xff]  }
  0x68   :  { %1495 = vmatprep.subr.bf16.mxu0 %v1741_v52  ;;  %v1771_v52 = vld [vmem:[%s2177_s7 + $0x8] sm:$0xff]  }
  0x69   :  { %1570 = vmatpush3.bf16.msra.mxu1 %v1740_v51  ;;  %v1770_v51 = vld [vmem:[%s2177_s7] sm:$0xff]  }
  0x6a   :  { %1571 = vmatprep.subr.bf16.mxu1 %v1869_v38 }
  0x6b   :  { %1496 = vmatpush3.bf16.msra.mxu0 %v1742_v53  ;;  %v1772_v53 = vld [vmem:[%s2177_s7 + $0x10] sm:$0xff]  }
  0x6c   :  { %1497 = vmatprep.subr.bf16.mxu0 %v1744_v55  ;;  %v1774_v55 = vld [vmem:[%s2177_s7 + $0x20] sm:$0xff]  }
  0x6d   :  { %1572 = vmatpush3.bf16.msra.mxu1 %v1743_v54  ;;  %v1773_v54 = vld [vmem:[%s2177_s7 + $0x18] sm:$0xff]  }
  0x6e   :  { %1573 = vmatprep.subr.bf16.mxu1 %v1869_v38 }
  0x6f   :  { %1498 = vmatpush3.bf16.msra.mxu0 %v1745_v56  ;;  %v1775_v56 = vld [vmem:[%s2177_s7 + $0x28] sm:$0xff]  }
  0x70   :  { %1499 = vmatprep.subr.bf16.mxu0 %v1747_v59 }
  0x71   :  { %1574 = vmatpush3.bf16.msra.mxu1 %v1746_v57  ;;  %v1396_v57 = vld [vmem:[%s2174_s4] ss:$0 sm:$0xff] }
  0x72   :  { %1575 = vmatprep.subr.bf16.mxu1 %v1869_v38 }
  0x73   :  { %1500 = vmatpush3.bf16.msra.mxu0 %v1748_v60 }
  0x74   :  { %1581 = vmatprep.subr.bf16.mxu0 %v1869_v38 }
  0x75   :  { %1576 = vmatpush3.bf16.msra.mxu1 %v1752_v61 }
  0x76   :  { %1601 = vmatprep.subr.bf16.mxu1 %v1869_v38  ;;  %700 = vmatmul.mubr.bf16.vlgmr.msra.gmra.mrb[4].mxu0 %v1749_v62 }
  0x77   :  { %1597 = vmatprep.mubr.msk.bf16.mxu0 %vm1870_vm0, %v1869_v38  ;;  %1582 = vmatpush3.bf16.msra.mxu0 %v1754_v0 }
  0x78   :  { %1578 = vmatmul.mubr.bf16.vlgmr.msra.gmra.mrb[4].mxu1 %v1753_v63  ;;  %1583 = vmatprep.subr.bf16.mxu0 %v1869_v38 }
  0x79   :  { %1617 = vmatprep.mubr.msk.bf16.mxu1 %vm1870_vm0, %v1869_v38  ;;  %1602 = vmatpush3.bf16.msra.mxu1 %v1762_v8  ;;  %v1781_v8 = vld [vmem:[#allocation4 + $0x18] sm:$0xff]  }
  0x7a   :  { %1603 = vmatprep.subr.bf16.mxu1 %v1869_v38 }
  0x7b   :  { %1584 = vmatpush3.bf16.msra.mxu0 %v1755_v1 }
  0x7c   :  { %1585 = vmatprep.subr.bf16.mxu0 %v1869_v38 }
  0x7d   :  { %1604 = vmatpush3.bf16.msra.mxu1 %v1763_v9  ;;  %v1782_v9 = vld [vmem:[#allocation4 + $0x20] sm:$0xff]  }
  0x7e   :  { %1605 = vmatprep.subr.bf16.mxu1 %v1869_v38 }
  0x7f   :  { %1586 = vmatpush3.bf16.msra.mxu0 %v1756_v2 }
  0x80   :  { %1587 = vmatprep.subr.bf16.mxu0 %v1869_v38 }
  0x81   :  { %1606 = vmatpush3.bf16.msra.mxu1 %v1764_v10  ;;  %v1783_v10 = vld [vmem:[#allocation4 + $0x28] sm:$0xff]  }
  0x82   :  { %1607 = vmatprep.subr.bf16.mxu1 %v1869_v38 }
  0x83   :  { %1588 = vmatpush3.bf16.msra.mxu0 %v1757_v3  ;;  %v1776_v3 = vld [vmem:[%s2177_s7 + $0x30] sm:$0xff]  }
  0x84   :  { %1589 = vmatprep.subr.bf16.mxu0 %v1869_v38 }
  0x85   :  { %1608 = vmatpush3.bf16.msra.mxu1 %v1765_v11  ;;  %v1405_v11 = vld [vmem:[%s2176_s6] ss:$0 sm:$0xff] }
  0x86   :  { %1609 = vmatprep.subr.bf16.mxu1 %v1869_v38 }
  0x87   :  { %1590 = vmatpush3.bf16.msra.mxu0 %v1758_v4  ;;  %v1777_v4 = vld [vmem:[%s2177_s7 + $0x38] sm:$0xff]  }
  0x88   :  { %1591 = vmatprep.subr.bf16.mxu0 %v1869_v38 }
  0x89   :  { %1610 = vmatpush3.bf16.msra.mxu1 %v1766_v12 }
  0x8a   :  { %1611 = vmatprep.subr.bf16.mxu1 %v1869_v38 }
  0x8b   :  { %1592 = vmatpush3.bf16.msra.mxu0 %v1759_v5  ;;  %v1778_v5 = vld [vmem:[#allocation4] sm:$0xff]  }
  0x8c   :  { %1593 = vmatprep.subr.bf16.mxu0 %v1869_v38 }
  0x8d   :  { %1612 = vmatpush3.bf16.msra.mxu1 %v1767_v13 }
  0x8e   :  { %1613 = vmatprep.subr.bf16.mxu1 %v1869_v38 }
  0x8f   :  { %1594 = vmatpush3.bf16.msra.mxu0 %v1760_v6  ;;  %v1779_v6 = vld [vmem:[#allocation4 + $0x8] sm:$0xff]  }
  0x90   :  { %1595 = vmatprep.subr.bf16.mxu0 %v1869_v38 }
  0x91   :  { %1614 = vmatpush3.bf16.msra.mxu1 %v1768_v49 }
  0x92   :  { %1615 = vmatprep.subr.bf16.mxu1 %v1869_v38 }
  0x93   :  { %1596 = vmatpush3.bf16.msra.mxu0 %v1761_v7  ;;  %v1780_v7 = vld [vmem:[#allocation4 + $0x10] sm:$0xff]  }
  0x94   :  { %1621 = vmatprep.subr.bf16.mxu0 %v1869_v38 }
  0x95   :  { %1616 = vmatpush3.bf16.msra.mxu1 %v1769_v50 }
  0x96   :  { %1641 = vmatprep.subr.bf16.mxu1 %v1869_v38 }
 0x129   :  { %v1457_v14 = vpop.f32.mrb[0].mxu0 }
 0x12a   :  { %v1458_v16 = vpop.f32.mrb[1].mxu0 }
 0x12b   :  { %v1459_v17 = vadd.f32 %v1458_v16, %v1457_v14  ;;  %v1460_v18 = vpop.f32.mrb[2].mxu0  ;;  %v1479_v19 = vpop.f32.mrb[0].mxu1 }
 0x12c   :  { %v1461_v20 = vpop.f32.mrb[3].mxu0  ;;  %v1480_v23 = vpop.f32.mrb[1].mxu1 }
 0x12d   :  { %v620_v21 = vadd.f32 %v1459_v17, %v1332_v15  ;;  %v1462_v22 = vadd.f32 %v1461_v20, %v1460_v18  ;;  %v1481_v24 = vadd.f32 %v1480_v23, %v1479_v19  ;;  %v1482_v25 = vpop.f32.mrb[2].mxu1  ;;  %v1786_v23 = vld [vmem:[#allocation6] sm:$0xff]  }
 0x12e   :  { %v1483_v27 = vpop.f32.mrb[3].mxu1 }
 0x12f   :  { %v623_v26 = vadd.f32 %v1462_v22, %v1332_v15  ;;  %v661_v28 = vadd.f32 %v1481_v24, %v620_v21  ;;  %v1484_v29 = vadd.f32 %v1483_v27, %v1482_v25  ;;  %v1784_v21 = vld [vmem:[#allocation4 + $0x30] sm:$0xff]   ;;  %v1785_v22 = vld [vmem:[#allocation4 + $0x38] sm:$0xff]   ;;  %v1787_v24 = vld [vmem:[#allocation6 + $0x8] sm:$0xff]  }
 0x130   :  { %v1788_v25 = vld [vmem:[#allocation6 + $0x10] sm:$0xff]   ;;  %v1790_v27 = vld [vmem:[#allocation6 + $0x20] sm:$0xff]  }
 0x131   :  { %v664_v30 = vadd.f32 %v1484_v29, %v623_v26  ;;  %v1789_v26 = vld [vmem:[#allocation6 + $0x18] sm:$0xff]   ;;  %v1414_v29 = vld [vmem:[%s2178_s8] ss:$0 sm:$0xff] }
 0x149   :  { %v1501_v31 = vpop.f32.mrb[4].mxu0 }
 0x14a   :  { %v1502_v32 = vpop.f32.mrb[5].mxu0 }
 0x14b   :  { %v742_v33 = vpop.f32.mrb[4].mxu1  ;;  %v1503_v34 = vadd.f32 %v1502_v32, %v1501_v31  ;;  %v1504_v35 = vpop.f32.mrb[6].mxu0 }
 0x14c   :  { %v1579_v36 = vpop.f32.mrb[5].mxu1  ;;  %v1505_v37 = vpop.f32.mrb[7].mxu0 }
 0x14d   :  { %v745_v39 = vpop.f32.mrb[6].mxu1  ;;  %v702_v40 = vadd.f32 %v1503_v34, %v661_v28  ;;  %v1506_v41 = vadd.f32 %v1505_v37, %v1504_v35  ;;  %v1791_v28 = vld [vmem:[#allocation6 + $0x28] sm:$0xff]  }
 0x14e   :  { %v1580_v42 = vpop.f32.mrb[7].mxu1 }
 0x14f   :  { %v743_v43 = vadd.f32 %v742_v33, %v702_v40  ;;  %v705_v44 = vadd.f32 %v1506_v41, %v664_v30  ;;  %v1792_v40 = vld [vmem:[#allocation6 + $0x30] sm:$0xff]   ;;  %v1793_v41 = vld [vmem:[#allocation6 + $0x38] sm:$0xff]   ;;  %v1423_v42 = vld [vmem:[%s2180_s10] ss:$0 sm:$0xff] }
 0x151   :  { %v746_v45 = vadd.f32 %v745_v39, %v705_v44  ;;  %v749_v46 = vmax.f32 %v743_v43, 0.0 }
 0x153   :  { %v750_v47 = vmax.f32 %v746_v45, 0.0 }
 0x155   :  { %v751_v48 = vpack.c.bf16 %v750_v47, %v749_v46 }
 0x157   :  { %1598 = vmatmul.mubr.bf16.vlgmr.msra.gmra.mrb[8].mxu0 %v751_v48 }
 0x158   :  { %1637 = vmatprep.mubr.msk.bf16.mxu0 %vm1870_vm0, %v1869_v38  ;;  %1622 = vmatpush3.bf16.msra.mxu0 %v1770_v51 }
 0x159   :  { %1623 = vmatprep.subr.bf16.mxu0 %v1869_v38 }
 0x15c   :  { %1624 = vmatpush3.bf16.msra.mxu0 %v1771_v52 }
 0x15d   :  { %1625 = vmatprep.subr.bf16.mxu0 %v1869_v38 }
 0x160   :  { %1626 = vmatpush3.bf16.msra.mxu0 %v1772_v53 }
 0x161   :  { %1627 = vmatprep.subr.bf16.mxu0 %v1869_v38 }
 0x164   :  { %1628 = vmatpush3.bf16.msra.mxu0 %v1773_v54 }
 0x165   :  { %1629 = vmatprep.subr.bf16.mxu0 %v1869_v38 }
 0x168   :  { %1630 = vmatpush3.bf16.msra.mxu0 %v1774_v55 }
 0x169   :  { %1631 = vmatprep.subr.bf16.mxu0 %v1869_v38 }
 0x16c   :  { %1632 = vmatpush3.bf16.msra.mxu0 %v1775_v56 }
 0x16d   :  { %1633 = vmatprep.subr.bf16.mxu0 %v1869_v38 }
 0x170   :  { %1634 = vmatpush3.bf16.msra.mxu0 %v1776_v3 }
 0x171   :  { %1635 = vmatprep.subr.bf16.mxu0 %v1869_v38 }
 0x174   :  { %1636 = vmatpush3.bf16.msra.mxu0 %v1777_v4 }
 0x175   :  { %1661 = vmatprep.subr.bf16.mxu0 %v1869_v38 }
 0x22a   :  { %v857_v58 = vpop.f32.mrb[8].mxu0 }
 0x22b   :  { %v858_v59 = vadd.f32 %v1396_v57, %v857_v58  ;;  %v1599_v60 = vpop.f32.mrb[9].mxu0 }
 0x22c   :  { %v860_v61 = vpop.f32.mrb[10].mxu0 }
 0x22d   :  { %v861_v62 = vadd.f32 %v1396_v57, %v860_v61  ;;  %v1600_v63 = vpop.f32.mrb[11].mxu0  ;;  %v864_v0 = vmax.f32 %v858_v59, 0.0 }
 0x22f   :  { %v865_v1 = vmax.f32 %v861_v62, 0.0 }
 0x231   :  { %v866_v2 = vpack.c.bf16 %v865_v1, %v864_v0 }
 0x233   :  { %1618 = vmatmul.mubr.bf16.vlgmr.msra.gmra.mrb[8].mxu1 %v866_v2 }
 0x234   :  { %1657 = vmatprep.mubr.msk.bf16.mxu1 %vm1870_vm0, %v1869_v38  ;;  %1642 = vmatpush3.bf16.msra.mxu1 %v1778_v5 }
 0x235   :  { %1643 = vmatprep.subr.bf16.mxu1 %v1869_v38 }
 0x238   :  { %1644 = vmatpush3.bf16.msra.mxu1 %v1779_v6 }
 0x239   :  { %1645 = vmatprep.subr.bf16.mxu1 %v1869_v38 }
 0x23c   :  { %1646 = vmatpush3.bf16.msra.mxu1 %v1780_v7 }
 0x23d   :  { %1647 = vmatprep.subr.bf16.mxu1 %v1869_v38 }
 0x240   :  { %1648 = vmatpush3.bf16.msra.mxu1 %v1781_v8 }
 0x241   :  { %1649 = vmatprep.subr.bf16.mxu1 %v1869_v38 }
 0x244   :  { %1650 = vmatpush3.bf16.msra.mxu1 %v1782_v9 }
 0x245   :  { %1651 = vmatprep.subr.bf16.mxu1 %v1869_v38 }
 0x248   :  { %1652 = vmatpush3.bf16.msra.mxu1 %v1783_v10 }
 0x249   :  { %1653 = vmatprep.subr.bf16.mxu1 %v1869_v38 }
 0x24c   :  { %1654 = vmatpush3.bf16.msra.mxu1 %v1784_v21 }
 0x24d   :  { %1655 = vmatprep.subr.bf16.mxu1 %v1869_v38 }
 0x250   :  { %1656 = vmatpush3.bf16.msra.mxu1 %v1785_v22 }
 0x306   :  { %v972_v12 = vpop.f32.mrb[8].mxu1 }
 0x307   :  { %v973_v13 = vadd.f32 %v1405_v11, %v972_v12  ;;  %v1619_v14 = vpop.f32.mrb[9].mxu1 }
 0x308   :  { %v975_v15 = vpop.f32.mrb[10].mxu1 }
 0x309   :  { %v976_v16 = vadd.f32 %v1405_v11, %v975_v15  ;;  %v1620_v17 = vpop.f32.mrb[11].mxu1  ;;  %v979_v18 = vmax.f32 %v973_v13, 0.0 }
 0x30b   :  { %v980_v19 = vmax.f32 %v976_v16, 0.0 }
 0x30d   :  { %v981_v20 = vpack.c.bf16 %v980_v19, %v979_v18 }
 0x30f   :  { %1638 = vmatmul.mubr.bf16.vlgmr.msra.gmra.mrb[12].mxu0 %v981_v20 }
 0x310   :  { %1677 = vmatprep.mubr.msk.bf16.mxu0 %vm1870_vm0, %v1869_v38  ;;  %1662 = vmatpush3.bf16.msra.mxu0 %v1786_v23 }
 0x311   :  { %1663 = vmatprep.subr.bf16.mxu0 %v1869_v38 }
 0x314   :  { %1664 = vmatpush3.bf16.msra.mxu0 %v1787_v24 }
 0x315   :  { %1665 = vmatprep.subr.bf16.mxu0 %v1869_v38 }
 0x318   :  { %1666 = vmatpush3.bf16.msra.mxu0 %v1788_v25 }
 0x319   :  { %1667 = vmatprep.subr.bf16.mxu0 %v1869_v38 }
 0x31c   :  { %1668 = vmatpush3.bf16.msra.mxu0 %v1789_v26 }
 0x31d   :  { %1669 = vmatprep.subr.bf16.mxu0 %v1869_v38 }
 0x320   :  { %1670 = vmatpush3.bf16.msra.mxu0 %v1790_v27 }
 0x321   :  { %1671 = vmatprep.subr.bf16.mxu0 %v1869_v38 }
 0x324   :  { %1672 = vmatpush3.bf16.msra.mxu0 %v1791_v28 }
 0x325   :  { %1673 = vmatprep.subr.bf16.mxu0 %v1869_v38 }
 0x328   :  { %1674 = vmatpush3.bf16.msra.mxu0 %v1792_v40 }
 0x329   :  { %1675 = vmatprep.subr.bf16.mxu0 %v1869_v38  ;;  %v1432_v38 = vld [vmem:[%s2182_s12] ss:$0 sm:$0xff] }
 0x32c   :  { %1676 = vmatpush3.bf16.msra.mxu0 %v1793_v41 }
 0x3e2   :  { %v1087_v30 = vpop.f32.mrb[12].mxu0 }
 0x3e3   :  { %v1088_v31 = vadd.f32 %v1414_v29, %v1087_v30  ;;  %v1639_v32 = vpop.f32.mrb[13].mxu0 }
 0x3e4   :  { %v1090_v33 = vpop.f32.mrb[14].mxu0 }
 0x3e5   :  { %v1091_v34 = vadd.f32 %v1414_v29, %v1090_v33  ;;  %v1640_v35 = vpop.f32.mrb[15].mxu0  ;;  %v1094_v36 = vmax.f32 %v1088_v31, 0.0 }
 0x3e7   :  { %v1095_v37 = vmax.f32 %v1091_v34, 0.0 }
 0x3e9   :  { %v1096_v39 = vpack.c.bf16 %v1095_v37, %v1094_v36 }
 0x3eb   :  { %1658 = vmatmul.mubr.bf16.vlgmr.msra.gmra.mrb[12].mxu1 %v1096_v39 }
 0x4be   :  { %v1202_v43 = vpop.f32.mrb[12].mxu1 }
 0x4bf   :  { %v1203_v44 = vadd.f32 %v1423_v42, %v1202_v43  ;;  %v1659_v45 = vpop.f32.mrb[13].mxu1 }
 0x4c0   :  { %v1205_v46 = vpop.f32.mrb[14].mxu1 }
 0x4c1   :  { %v1206_v47 = vadd.f32 %v1423_v42, %v1205_v46  ;;  %v1660_v48 = vpop.f32.mrb[15].mxu1  ;;  %v1209_v49 = vmax.f32 %v1203_v44, 0.0 }
 0x4c3   :  { %v1210_v50 = vmax.f32 %v1206_v47, 0.0 }
 0x4c5   :  { %v1211_v51 = vpack.c.bf16 %v1210_v50, %v1209_v49 }
 0x4c7   :  { %1678 = vmatmul.mubr.bf16.vlgmr.msra.gmra.mrb[16].mxu0 %v1211_v51 }
 0x59a   :  { %v1317_v52 = vpop.f32.mrb[16].mxu0 }
 0x59b   :  { %v1318_v53 = vadd.f32 %v1432_v38, %v1317_v52  ;;  %v1679_v54 = vpop.f32.mrb[17].mxu0 }
 0x59c   :  { %v1320_v55 = vpop.f32.mrb[18].mxu0 }
 0x59d   :  { %1324 = vst [vmem:[%s2183_s13] sm:$0xff] %v1318_v53  ;;  %v1321_v56 = vadd.f32 %v1432_v38, %v1320_v55  ;;  %v1680_v57 = vpop.f32.mrb[19].mxu0 }
 0x59f   :  { %1325 = vst [vmem:[%s2183_s13 + $0x8] sm:$0xff] %v1321_v56 }
 0x5a0   :  { %1330 = vsyncpa [#allocation3], 1 }
 0x5a1   :  { %1331 = vsyncpa [#allocation5], 1 }

</bundles_post_ra>
